<compile_context>
chip_gen: v5e
topology: v5e:2x2
jax: 0.10.0
libtpu: 0.0.40
codegen_flags: <defaults>
</compile_context>

<pallas_src>
import jax
import jax.numpy as jnp
from jax.experimental import pallas as pl
from jax.experimental.pallas import tpu as pltpu

MARGIN = 2.0
EPS = 1e-6  # F.pairwise_distance default eps


def _vmem_limit_bytes():
    """Per-generation scoped-VMEM limit: physical capacity minus fixed headroom
    (output double-buffers, semaphores, compiler scratch).  Never the full
    physical size -- v7x only has 64 MiB per TensorCore."""
    try:
        cap = int(pltpu.get_tpu_info().vmem_capacity_bytes)
    except Exception:
        cap = 64 << 20  # conservative fallback (v7x per-TC VMEM)
    return max(32 << 20, min(cap - (12 << 20), 96 << 20))


def _choose_tile_rows(B, D, itemsize, vmem_limit):
    """Largest batch tile TB whose resident VMEM footprint fits the limit.

    Dtype-aware footprint per batch row:
      * 2 embedding inputs x 2 pipeline buffers x D x itemsize   (streamed tiles)
      * ~3 f32-widened (TB, D) compute temporaries (x1/x2 casts, diff, diff^2)
      * target + per-sample-loss blocks (f32, lane width 1)       (negligible)
    """
    per_row = 4 * D * itemsize + 3 * D * 4 + 8 * 4
    budget = vmem_limit - (4 << 20)
    tb = budget // per_row
    if tb >= B:
        return B  # single tile; block dim == full batch is always legal
    return max(8, (int(tb) // 8) * 8)


def _contrastive_loss_kernel(x1_ref, x2_ref, t_ref, loss_ref):
    x1 = x1_ref[...].astype(jnp.float32)   # (TB, D)
    x2 = x2_ref[...].astype(jnp.float32)   # (TB, D)
    t = t_ref[...]                          # (TB, 1) f32

    # torch.F.pairwise_distance(x1, x2, eps=1e-6, keepdim=True): ||x1 - x2 + eps||_2.
    diff = x1 - x2 + EPS
    sq = jnp.sum(diff * diff, axis=-1, keepdims=True)   # (TB, 1) sum of squares
    # TODO(synk): for small D (<~256) on v6e, route this row-reduce through the
    # idle MXU (dot with a ones matrix) to offload the XLU; neutral at large D.
    dist = jnp.sqrt(sq)                                  # only needed for hinge

    hinge = jnp.maximum(MARGIN - dist, 0.0)
    # t * sq == t * dist**2 without re-squaring the sqrt result.
    loss_ref[...] = t * sq + (1.0 - t) * hinge * hinge   # per-sample loss (TB, 1)


def contrastive_loss(output1, output2, target, *, reduction="mean", tile_rows=None):
    """output1, output2: (B, D); target: (B,) or (B, 1) binary labels."""
    B, D = output1.shape
    itemsize = jnp.dtype(output1.dtype).itemsize
    target_f = target.astype(jnp.float32).reshape(B, 1)

    vmem_limit = _vmem_limit_bytes()
    if tile_rows is None:
        TB = _choose_tile_rows(B, D, itemsize, vmem_limit)
    else:  # explicit override (used to force the multi-tile path in tests)
        TB = min(int(tile_rows), B)
        if TB < B:
            TB = max(8, (TB // 8) * 8)
    num_tiles = pl.cdiv(B, TB)
    # TODO(synk): for very large D (row footprint > budget) add a second
    # 'arbitrary' grid axis over D with a (TB, 1) sum-of-squares accumulator
    # instead of shrinking TB below 8.

    cost = pl.CostEstimate(
        flops=4 * B * D + 8 * B,
        transcendentals=B,                                   # one sqrt per row
        bytes_accessed=2 * B * D * itemsize + 2 * B * 4,     # inputs + target/out
    )

    per_sample = pl.pallas_call(
        _contrastive_loss_kernel,
        out_shape=jax.ShapeDtypeStruct((B, 1), jnp.float32),
        grid_spec=pltpu.PrefetchScalarGridSpec(
            num_scalar_prefetch=0,
            grid=(num_tiles,),
            in_specs=[
                pl.BlockSpec((TB, D), lambda i: (i, 0)),
                pl.BlockSpec((TB, D), lambda i: (i, 0)),
                pl.BlockSpec((TB, 1), lambda i: (i, 0)),
            ],
            out_specs=pl.BlockSpec((TB, 1), lambda i: (i, 0)),
        ),
        compiler_params=pltpu.CompilerParams(
            # Independent per-tile work: 'parallel' lets a multi-TC part (v7x)
            # shard the batch axis across cores; no-op on v5e/v6e.
            # TODO(synk): evaluate pltpu.CORE_PARALLEL on v7x if plain
            # 'parallel' leaves the second TensorCore idle.
            dimension_semantics=("parallel",),
            vmem_limit_bytes=int(vmem_limit),
        ),
        cost_estimate=cost,
    )(output1, output2, target_f)

    if reduction == "none":
        return per_sample
    if reduction == "sum":
        return jnp.sum(per_sample)
    return jnp.sum(per_sample) / B  # 'mean'


def _reference(output1, output2, target):
    # Pure-JAX reference mirroring the PyTorch module exactly (mean reduction).
    diff = output1.astype(jnp.float32) - output2.astype(jnp.float32) + EPS
    dist = jnp.sqrt(jnp.sum(diff * diff, axis=-1, keepdims=True))
    t = target.astype(jnp.float32).reshape(-1, 1)
    loss = t * dist**2 + (1.0 - t) * jnp.clip(MARGIN - dist, 0.0) ** 2
    return jnp.mean(loss)


if __name__ == "__main__":
    key = jax.random.PRNGKey(0)
    k1, k2, k3 = jax.random.split(key, 3)

    # Small shape consistent with the module: batch=8 pairs, embedding dim=32.
    B, D = 8, 32
    o1 = jax.random.normal(k1, (B, D), dtype=jnp.float32)
    o2 = jax.random.normal(k2, (B, D), dtype=jnp.float32)
    tgt = (jax.random.uniform(k3, (B, 1)) > 0.5).astype(jnp.float32)

    loss = jax.block_until_ready(contrastive_loss(o1, o2, tgt))
    ref = _reference(o1, o2, tgt)
    assert jnp.allclose(loss, ref, rtol=1e-5, atol=1e-5), (loss, ref)

    # Multi-tile + partial-last-tile path, actually forced this time:
    # B=300 rows with TB=128 -> 3 grid steps, last tile has only 44 valid rows.
    B2, D2 = 300, 128
    o1b = jax.random.normal(k1, (B2, D2), dtype=jnp.bfloat16)
    o2b = jax.random.normal(k2, (B2, D2), dtype=jnp.bfloat16)
    t2 = (jax.random.uniform(k3, (B2, 1)) > 0.5).astype(jnp.float32)
    l2 = jax.block_until_ready(contrastive_loss(o1b, o2b, t2, tile_rows=128))
    r2 = _reference(o1b, o2b, t2)
    assert jnp.allclose(l2, r2, rtol=1e-3, atol=1e-3), (l2, r2)

    # Same inputs, auto tile sizing (single tile covering all 300 rows).
    l3 = jax.block_until_ready(contrastive_loss(o1b, o2b, t2))
    assert jnp.allclose(l3, r2, rtol=1e-3, atol=1e-3), (l3, r2)

    print("KERNEL_OK")
</pallas_src>

<mosaic_0001>
module attributes {stable_mosaic.version = 11 : i64} {
  func.func @_contrastive_loss_kernel(%arg0: i32, %arg1: memref<8x32xf32, #tpu.memory_space<vmem>>, %arg2: memref<8x32xf32, #tpu.memory_space<vmem>>, %arg3: memref<8x1xf32, #tpu.memory_space<vmem>>, %arg4: memref<8x1xf32, #tpu.memory_space<vmem>>) attributes {dimension_semantics = [#tpu.dimension_semantics<parallel>], iteration_bounds = array<i64: 1>, scalar_prefetch = 0 : i64, scratch_operands = 0 : i64, tpu.core_type = #tpu.core_type<tc>, window_params = [{transform_indices = @transform_0, window_bounds = array<i64: 8, 32>}, {transform_indices = @transform_1, window_bounds = array<i64: 8, 32>}, {transform_indices = @transform_2, window_bounds = array<i64: 8, 1>}, {transform_indices = @transform_3, window_bounds = array<i64: 8, 1>}]} {
    %c0 = arith.constant 0 : index
    %c0_0 = arith.constant 0 : index
    %0 = vector.load %arg1[%c0, %c0_0] : memref<8x32xf32, #tpu.memory_space<vmem>>, vector<8x32xf32>
    %c0_1 = arith.constant 0 : index
    %c0_2 = arith.constant 0 : index
    %1 = vector.load %arg2[%c0_1, %c0_2] : memref<8x32xf32, #tpu.memory_space<vmem>>, vector<8x32xf32>
    %c0_3 = arith.constant 0 : index
    %c0_4 = arith.constant 0 : index
    %2 = vector.load %arg3[%c0_3, %c0_4] : memref<8x1xf32, #tpu.memory_space<vmem>>, vector<8x1xf32>
    %3 = arith.subf %0, %1 : vector<8x32xf32>
    %cst = arith.constant 9.99999997E-7 : f32
    %4 = vector.broadcast %cst : f32 to vector<8x32xf32>
    %5 = arith.addf %3, %4 : vector<8x32xf32>
    %6 = arith.mulf %5, %5 : vector<8x32xf32>
    %cst_5 = arith.constant dense<0.000000e+00> : vector<8xf32>
    %7 = vector.multi_reduction <add>, %6, %cst_5 [1] : vector<8x32xf32> to vector<8xf32>
    %8 = vector.shape_cast %7 : vector<8xf32> to vector<8x1xf32>
    %9 = math.sqrt %8 : vector<8x1xf32>
    %cst_6 = arith.constant 2.000000e+00 : f32
    %10 = vector.broadcast %cst_6 : f32 to vector<8x1xf32>
    %11 = arith.subf %10, %9 : vector<8x1xf32>
    %cst_7 = arith.constant 0.000000e+00 : f32
    %12 = vector.broadcast %cst_7 : f32 to vector<8x1xf32>
    %13 = arith.maximumf %11, %12 : vector<8x1xf32>
    %14 = arith.mulf %2, %8 : vector<8x1xf32>
    %cst_8 = arith.constant 1.000000e+00 : f32
    %15 = vector.broadcast %cst_8 : f32 to vector<8x1xf32>
    %16 = arith.subf %15, %2 : vector<8x1xf32>
    %17 = arith.mulf %16, %13 : vector<8x1xf32>
    %18 = arith.mulf %17, %13 : vector<8x1xf32>
    %19 = arith.addf %14, %18 : vector<8x1xf32>
    %c0_9 = arith.constant 0 : index
    %c0_10 = arith.constant 0 : index
    %20 = vector.load %arg4[%c0_9, %c0_10] : memref<8x1xf32, #tpu.memory_space<vmem>>, vector<8x1xf32>
    tpu.vector_store %arg4[%c0_9, %c0_10], %19 {strides = array<i32>} : memref<8x1xf32, #tpu.memory_space<vmem>>, vector<8x1xf32>,
    return
  }
  func.func @transform_0(%arg0: i32) -> (i32, i32) {
    %c0_i32 = arith.constant 0 : i32
    %c0_i32_0 = arith.constant 0 : i32
    return %arg0, %c0_i32 : i32, i32
  }
  func.func @transform_1(%arg0: i32) -> (i32, i32) {
    %c0_i32 = arith.constant 0 : i32
    %c0_i32_0 = arith.constant 0 : i32
    return %arg0, %c0_i32 : i32, i32
  }
  func.func @transform_2(%arg0: i32) -> (i32, i32) {
    %c0_i32 = arith.constant 0 : i32
    %c0_i32_0 = arith.constant 0 : i32
    return %arg0, %c0_i32 : i32, i32
  }
  func.func @transform_3(%arg0: i32) -> (i32, i32) {
    %c0_i32 = arith.constant 0 : i32
    %c0_i32_0 = arith.constant 0 : i32
    return %arg0, %c0_i32 : i32, i32
  }
}

</mosaic_0001>

<bundles_post_ra>
// kernel: tpu_custom_call.1
= control target key start
LH: loop header
LB: loop body
LE: loop exit
PB: predicated region body
PF: predicated region fallthrough
CT: control target
= control target key end

     0   :  { %8 = vsyncpa [#allocation3], 0  ;;  %s93_s15 = smov [#allocation2]   ;;  %s126_s0 = inlined_call_operand.vmem [shape: f32[8,32], index: 0, kind: input, shape index: {}]   ;;  %s127_s1 = inlined_call_operand.hbm [shape: f32[8,32], index: 1, kind: input, shape index: {}]   ;;  %s128_s2 = inlined_call_operand.vmem [shape: f32[8,1], index: 2, kind: input, shape index: {}]   ;;  %s129_s3 = inlined_call_operand.vmem [shape: f32[8,1], index: 3, kind: output, shape index: {}]  }
   0x1   :  { %s16_s14 = sshll.u32 %s127_s1, 4  ;;  %s18_s16 = sshll.u32 %s93_s15, 4  ;;  %s17_s14 = int_to_ptr.hbm [resolvable:$true] %s16_s14  ;;  %s19_s16 = int_to_ptr.vmem [resolvable:$true] %s18_s16 }
   0x2   :  { %21 = dma.hbm_to_vmem [thread:$0]  %s17_s14, 128, %s19_s16, [#allocation3]  }
   0x3   :  { %91 = dma.done.wait [#allocation3], 128  }
   0x4   :  { %92 = vsyncadd [#allocation3], 4294967168  ;;  %v28_v0 = vld [vmem:[%s126_s0] sm:$0xff]  ;;  %vm34_vm0 = vcmask 261120   ;;  %vm57_vm3 = vcmask 7168  }
   0x5   :  { %v29_v1 = vld [vmem:[#allocation2] sm:$0xff] }
   0x6   :  { %v31_v2 = vsub.f32 %v28_v0, %v29_v1  ;;  %v30_v16 = vld [vmem:[%s128_s2] sm:$0xff] }
   0x7   :  { %v53_v19 = vsub.f32 1.0, %v30_v16 }
   0x8   :  { %v32_v3 = vadd.f32 1e-06, %v31_v2 }
   0xa   :  { %v33_v4 = vmul.f32 %v32_v3, %v32_v3 }
   0xc   :  { %v35_v5 = vsel %vm34_vm0, %v33_v4, 0.0 }
   0xd   :  { %36 = vadd.xlane.f32.xlu0 %v35_v5 }
  0x80   :  { %v37_v6 = vpop.xlane.xlu0 %36 }
  0x81   :  { %65 = vrsqrt.f32 %v37_v6  ;;  %vm45_vm1 = vcmp.eq.f32.partialorder %v37_v6, inf  ;;  %v48_v14 = vand.u32 2147483648, %v37_v6  ;;  %vm47_vm2 = vcmp.eq.f32.partialorder %v37_v6, 0.0 }
  0x82   :  { %v52_v22 = vmul.f32 %v37_v6, %v30_v16 }
  0x87   :  { %v66_v7 = vpop.eup %65 }
  0x88   :  { %v39_v8 = vmul.f32 %v66_v7, %v37_v6 }
  0x8a   :  { %v40_v9 = vmul.f32 %v66_v7, %v39_v8 }
  0x8c   :  { %v41_v10 = vmul.f32 0.5, %v40_v9 }
  0x8e   :  { %v42_v11 = vsub.f32 1.5, %v41_v10 }
  0x90   :  { %v43_v12 = vmul.f32 %v66_v7, %v42_v11 }
  0x92   :  { %v44_v13 = vmul.f32 %v43_v12, %v37_v6 }
  0x94   :  { %v46_v15 = vsel %vm45_vm1, %v37_v6, %v44_v13 }
  0x95   :  { %v49_v17 = vsel %vm47_vm2, %v48_v14, %v46_v15 }
  0x96   :  { %v50_v18 = vsub.f32 2.0, %v49_v17 }
  0x98   :  { %v51_v20 = vmax.f32 %v50_v18, 0.0 }
  0x9a   :  { %v54_v21 = vmul.f32 %v53_v19, %v51_v20 }
  0x9c   :  { %v55_v23 = vmul.f32 %v54_v21, %v51_v20 }
  0x9e   :  { %v56_v24 = vadd.f32 %v55_v23, %v52_v22 }
  0xa0   :  { %58 = vst.msk [vmem:[%s129_s3] sm:$0xff] %vm57_vm3, %v56_v24 }
  0xa1   :  { %63 = vsyncpa [#allocation3], 1 }

</bundles_post_ra>
